<compile_context>
chip_gen: v6e
topology: v6e:2x2x1
jax: 0.10.0
libtpu: 0.0.40
codegen_flags: <defaults>
</compile_context>

<pallas_src>
import functools

import jax
import jax.numpy as jnp
from jax import lax
from jax.experimental import pallas as pl
from jax.experimental.pallas import tpu as pltpu

_LANE = 128


# ---------------------------------------------------------------------------
# Small helpers
# ---------------------------------------------------------------------------

def _round_up(x, m):
    return ((x + m - 1) // m) * m


def _pad_to(a, shape):
    pads = [(0, t - s) for s, t in zip(a.shape, shape)]
    if all(p == (0, 0) for p in pads):
        return a
    return jnp.pad(a, pads)


def _vmem_spec():
    # Whole array resident in VMEM, no grid, no double buffering.
    return pl.BlockSpec(memory_space=pltpu.MemorySpace.VMEM)


# ---------------------------------------------------------------------------
# Pallas kernels
# ---------------------------------------------------------------------------

def _featurize_gram_kernel(x_ref, w1_ref, b1_ref, w2_ref, b2_ref,
                           k_ref, phi_ref, *, n_train, ridge):
    """phi = MLP([x_train; x_test_pad]);  K_train = phi_tr phi_tr^T + ridge*I."""
    # Single batched MLP pass (bf16 operands, f32 accumulation on the MXU).
    h = jnp.dot(x_ref[...], w1_ref[...],
                preferred_element_type=jnp.float32) + b1_ref[...]
    h = jnp.maximum(h, 0.0)
    phi = jnp.dot(h.astype(jnp.bfloat16), w2_ref[...],
                  preferred_element_type=jnp.float32) + b2_ref[...]
    phi_ref[...] = phi

    # Gram of the train rows, expressed as a trans_b dot_general (contract last
    # dims) so the MXU consumes phi directly — no explicit XLU transpose.
    phi_tr = phi[:n_train, :]
    k = lax.dot_general(phi_tr, phi_tr,
                        dimension_numbers=(((1,), (1,)), ((), ())),
                        preferred_element_type=jnp.float32,
                        precision=lax.Precision.HIGHEST)
    if ridge != 0.0:  # static trace-time constant (alpha * N_train)
        rows = lax.broadcasted_iota(jnp.int32, k.shape, 0)
        cols = lax.broadcasted_iota(jnp.int32, k.shape, 1)
        k = k + jnp.where(rows == cols, jnp.float32(ridge), jnp.float32(0.0))
    k_ref[...] = k


def _predict_kernel(phi_ref, alpha_hat_ref, y_t_ref, *, n_train):
    """y^T = (alpha_hat^T @ phi_tr) @ phi_te^T — K_test never materialized."""
    phi = phi_ref[...]
    phi_tr = phi[:n_train, :]
    phi_te = phi[n_train:, :]
    # t = alpha_hat^T @ phi_tr  -> (D_OUT, F_pad)
    t = lax.dot_general(alpha_hat_ref[...], phi_tr,
                        dimension_numbers=(((0,), (0,)), ((), ())),
                        preferred_element_type=jnp.float32,
                        precision=lax.Precision.HIGHEST)
    # y^T = t @ phi_te^T -> (D_OUT, M_pad): lane-dense (M_pad % 128 == 0) store.
    y_t_ref[...] = lax.dot_general(t, phi_te,
                                   dimension_numbers=(((1,), (1,)), ((), ())),
                                   preferred_element_type=jnp.float32,
                                   precision=lax.Precision.HIGHEST)


# ---------------------------------------------------------------------------
# pallas_call wrappers (whole-array VMEM residency, no grid)
# ---------------------------------------------------------------------------

def featurize_and_gram(x_all, w1, b1, w2, b2, *, n_train, ridge):
    r = x_all.shape[0]
    f_pad = w2.shape[1]
    kernel = functools.partial(_featurize_gram_kernel,
                               n_train=n_train, ridge=float(ridge))
    return pl.pallas_call(
        kernel,
        out_shape=(
            jax.ShapeDtypeStruct((n_train, n_train), jnp.float32),  # K_train
            jax.ShapeDtypeStruct((r, f_pad), jnp.float32),          # phi (train+test)
        ),
        in_specs=[_vmem_spec()] * 5,
        out_specs=(_vmem_spec(), _vmem_spec()),
    )(x_all, w1, b1, w2, b2)


def predict(phi_all, alpha_hat, *, n_train):
    m_pad = phi_all.shape[0] - n_train
    d_out = alpha_hat.shape[1]
    kernel = functools.partial(_predict_kernel, n_train=n_train)
    return pl.pallas_call(
        kernel,
        out_shape=jax.ShapeDtypeStruct((d_out, m_pad), jnp.float32),
        in_specs=[_vmem_spec(), _vmem_spec()],
        out_specs=_vmem_spec(),
    )(phi_all, alpha_hat)


# ---------------------------------------------------------------------------
# Full forward pass of KernelRidgeRegression_MLP
# ---------------------------------------------------------------------------

def krr_mlp_forward(x_train, y_train, x_test, mlp_params, alpha):
    w1, b1, w2, b2 = mlp_params
    n_train, d_in = x_train.shape
    n_test = x_test.shape[0]
    hidden = w1.shape[1]
    d_feat = w2.shape[1]
    ridge = float(alpha) * n_train  # alpha * N_train (static, matches reference)

    # Lane-dense padding of all feature axes (exact: zero-padded inputs /
    # weights / biases contribute nothing through Linear->ReLU->Linear->Gram).
    d_in_p = _round_up(d_in, _LANE)
    h_p = _round_up(hidden, _LANE)
    f_p = _round_up(d_feat, _LANE)
    m_p = _round_up(n_test, _LANE)   # padded test rows -> lane-dense y^T store

    x_all = jnp.concatenate(
        [_pad_to(x_train.astype(jnp.float32), (n_train, d_in_p)),
         _pad_to(x_test.astype(jnp.float32), (m_p, d_in_p))],
        axis=0).astype(jnp.bfloat16)
    w1_p = _pad_to(w1, (d_in_p, h_p)).astype(jnp.bfloat16)
    b1_p = _pad_to(b1.reshape(1, -1), (1, h_p)).astype(jnp.float32)
    w2_p = _pad_to(w2, (h_p, f_p)).astype(jnp.bfloat16)
    b2_p = _pad_to(b2.reshape(1, -1), (1, f_p)).astype(jnp.float32)

    k_train, phi_all = featurize_and_gram(
        x_all, w1_p, b1_p, w2_p, b2_p, n_train=n_train, ridge=ridge)

    # TODO(synk): dense SPD solve has no clean Pallas equivalent; K_train is SPD
    # by construction, so Cholesky solve == torch.inverse(K_train) @ y_train.
    c, low = jax.scipy.linalg.cho_factor(k_train, lower=True)
    alpha_hat = jax.scipy.linalg.cho_solve((c, low), y_train.astype(jnp.float32))

    y_t = predict(phi_all, alpha_hat, n_train=n_train)   # (D_OUT, M_pad)
    return y_t[:, :n_test].T                              # (M, D_OUT)


# ---------------------------------------------------------------------------
# Demo
# ---------------------------------------------------------------------------

if __name__ == "__main__":
    key = jax.random.PRNGKey(0)
    k_xtr, k_ytr, k_xte, k_w1, k_b1, k_w2, k_b2 = jax.random.split(key, 7)

    N_TRAIN, N_TEST, D_IN, HIDDEN, D_FEAT, D_OUT = 8, 4, 16, 32, 16, 1
    ALPHA = 0.1

    x_train = jax.random.normal(k_xtr, (N_TRAIN, D_IN), dtype=jnp.float32)
    y_train = jax.random.normal(k_ytr, (N_TRAIN, D_OUT), dtype=jnp.float32)
    x_test = jax.random.normal(k_xte, (N_TEST, D_IN), dtype=jnp.float32)

    # MLP parameters: Linear(D_IN, HIDDEN) -> ReLU -> Linear(HIDDEN, D_FEAT)
    w1 = jax.random.normal(k_w1, (D_IN, HIDDEN), dtype=jnp.float32) * 0.1
    b1 = jax.random.normal(k_b1, (1, HIDDEN), dtype=jnp.float32) * 0.1
    w2 = jax.random.normal(k_w2, (HIDDEN, D_FEAT), dtype=jnp.float32) * 0.1
    b2 = jax.random.normal(k_b2, (1, D_FEAT), dtype=jnp.float32) * 0.1

    y_pred = krr_mlp_forward(x_train, y_train, x_test, (w1, b1, w2, b2), ALPHA)
    y_pred = jax.block_until_ready(y_pred)

    assert y_pred.shape == (N_TEST, D_OUT)
    assert bool(jnp.all(jnp.isfinite(y_pred)))
    print("KERNEL_OK")
</pallas_src>

<mosaic_0001>
module attributes {stable_mosaic.version = 11 : i64} {
  func.func @_featurize_gram_kernel(%arg0: memref<136x128xbf16, #tpu.memory_space<vmem>>, %arg1: memref<128x128xbf16, #tpu.memory_space<vmem>>, %arg2: memref<1x128xf32, #tpu.memory_space<vmem>>, %arg3: memref<128x128xbf16, #tpu.memory_space<vmem>>, %arg4: memref<1x128xf32, #tpu.memory_space<vmem>>, %arg5: memref<8x8xf32, #tpu.memory_space<vmem>>, %arg6: memref<136x128xf32, #tpu.memory_space<vmem>>) attributes {dimension_semantics = [], scalar_prefetch = 0 : i64, scratch_operands = 0 : i64, tpu.core_type = #tpu.core_type<tc>} {
    %c0 = arith.constant 0 : index
    %c0_0 = arith.constant 0 : index
    %0 = vector.load %arg0[%c0, %c0_0] : memref<136x128xbf16, #tpu.memory_space<vmem>>, vector<136x128xbf16>
    %c0_1 = arith.constant 0 : index
    %c0_2 = arith.constant 0 : index
    %1 = vector.load %arg1[%c0_1, %c0_2] : memref<128x128xbf16, #tpu.memory_space<vmem>>, vector<128x128xbf16>
    %cst = arith.constant dense<0.000000e+00> : vector<136x128xf32>
    %2 = tpu.matmul %0, %1, %cst {dimension_numbers = #tpu.dot_dimension_numbers<[1], [0], [0], [1], [0, 0, 1, 1], [], []>} : vector<136x128xbf16>, vector<128x128xbf16>, vector<136x128xf32> -> vector<136x128xf32>
    %c0_3 = arith.constant 0 : index
    %c0_4 = arith.constant 0 : index
    %3 = vector.load %arg2[%c0_3, %c0_4] : memref<1x128xf32, #tpu.memory_space<vmem>>, vector<1x128xf32>
    %4 = vector.broadcast %3 : vector<1x128xf32> to vector<136x128xf32>
    %5 = arith.addf %2, %4 : vector<136x128xf32>
    %cst_5 = arith.constant 0.000000e+00 : f32
    %6 = vector.broadcast %cst_5 : f32 to vector<136x128xf32>
    %7 = arith.maximumf %5, %6 : vector<136x128xf32>
    %8 = arith.truncf %7 : vector<136x128xf32> to vector<136x128xbf16>
    %c0_6 = arith.constant 0 : index
    %c0_7 = arith.constant 0 : index
    %9 = vector.load %arg3[%c0_6, %c0_7] : memref<128x128xbf16, #tpu.memory_space<vmem>>, vector<128x128xbf16>
    %cst_8 = arith.constant dense<0.000000e+00> : vector<136x128xf32>
    %10 = tpu.matmul %8, %9, %cst_8 {dimension_numbers = #tpu.dot_dimension_numbers<[1], [0], [0], [1], [0, 0, 1, 1], [], []>} : vector<136x128xbf16>, vector<128x128xbf16>, vector<136x128xf32> -> vector<136x128xf32>
    %c0_9 = arith.constant 0 : index
    %c0_10 = arith.constant 0 : index
    %11 = vector.load %arg4[%c0_9, %c0_10] : memref<1x128xf32, #tpu.memory_space<vmem>>, vector<1x128xf32>
    %12 = vector.broadcast %11 : vector<1x128xf32> to vector<136x128xf32>
    %13 = arith.addf %10, %12 : vector<136x128xf32>
    %c0_11 = arith.constant 0 : index
    %c0_12 = arith.constant 0 : index
    %14 = vector.load %arg6[%c0_11, %c0_12] : memref<136x128xf32, #tpu.memory_space<vmem>>, vector<136x128xf32>
    tpu.vector_store %arg6[%c0_11, %c0_12], %13 {strides = array<i32>} : memref<136x128xf32, #tpu.memory_space<vmem>>, vector<136x128xf32>,
    %15 = vector.extract_strided_slice %13 {offsets = [0, 0], sizes = [8, 128], strides = [1, 1]} : vector<136x128xf32> to vector<8x128xf32>
    %cst_13 = arith.constant dense<0.000000e+00> : vector<8x8xf32>
    %16 = tpu.matmul %15, %15, %cst_13 {dimension_numbers = #tpu.dot_dimension_numbers<[1], [1], [0], [0], [0, 0, 1, 0], [], []>, precision = #tpu.contract_precision<fp32>} : vector<8x128xf32>, vector<8x128xf32>, vector<8x8xf32> -> vector<8x8xf32>
    %17 = tpu.iota {dimensions = array<i32: 0>} : vector<8x8xi32>
    %18 = tpu.iota {dimensions = array<i32: 1>} : vector<8x8xi32>
    %19 = arith.cmpi eq, %17, %18 : vector<8x8xi32>
    %cst_14 = arith.constant 8.000000e-01 : f32
    %cst_15 = arith.constant 0.000000e+00 : f32
    %20 = vector.broadcast %cst_14 : f32 to vector<8x8xf32>
    %21 = vector.broadcast %cst_15 : f32 to vector<8x8xf32>
    %22 = arith.select %19, %20, %21 : vector<8x8xi1>, vector<8x8xf32>
    %23 = arith.addf %16, %22 : vector<8x8xf32>
    %c0_16 = arith.constant 0 : index
    %c0_17 = arith.constant 0 : index
    %24 = vector.load %arg5[%c0_16, %c0_17] : memref<8x8xf32, #tpu.memory_space<vmem>>, vector<8x8xf32>
    tpu.vector_store %arg5[%c0_16, %c0_17], %23 {strides = array<i32>} : memref<8x8xf32, #tpu.memory_space<vmem>>, vector<8x8xf32>,
    return
  }
}

</mosaic_0001>

<bundles_post_ra>
// kernel: tpu_custom_call.1
= control target key start
LH: loop header
LB: loop body
LE: loop exit
PB: predicated region body
PF: predicated region fallthrough
CT: control target
= control target key end

     0   :  { %12 = vsyncpa [#allocation3], 0  ;;  %s1541_s0 = inlined_call_operand.hbm [shape: bf16[136,128], index: 0, kind: input, shape index: {}]   ;;  %s1542_s1 = inlined_call_operand.hbm [shape: bf16[128,128], index: 1, kind: input, shape index: {}]   ;;  %s1543_s2 = inlined_call_operand.vmem [shape: f32[1,128], index: 2, kind: input, shape index: {}]   ;;  %s1544_s3 = inlined_call_operand.hbm [shape: bf16[128,128], index: 3, kind: input, shape index: {}]   ;;  %s1545_s4 = inlined_call_operand.vmem [shape: f32[1,128], index: 4, kind: input, shape index: {}]   ;;  %s1546_s5 = inlined_call_operand.hbm [shape: f32[8,8], index: 5, kind: output, shape index: {0}]   ;;  %s1547_s6 = inlined_call_operand.hbm [shape: f32[136,128], index: 6, kind: output, shape index: {1}]  }
   0x1   :  { %13 = vsyncpa [#allocation6], 0 }
   0x2   :  { %14 = vsyncpa [#allocation4], 0 }
   0x3   :  { %15 = vsyncpa [#allocation10], 0  ;;  %s1365_s21 = smov [#allocation5]   ;;  %s1366_s23 = smov [#allocation2]  }
   0x4   :  { %s33_s22 = sshll.u32 %s1365_s21, 4  ;;  %s21_s24 = sshll.u32 %s1366_s23, 4  ;;  %s34_s22 = int_to_ptr.vmem [resolvable:$true] %s33_s22  ;;  %s22_s24 = int_to_ptr.vmem [resolvable:$true] %s21_s24 }
   0x5   :  { %s1265_s25 = scalar_lea.vmem %s34_s22, 1024  ;;  %p1270_p1 = scmp.lt.s32.totalorder %s34_s22, %s34_s22 }
   0x6   :  { %p1266_p0 = scmp.ne.s32.totalorder %s34_s22, %s1265_s25  ;;  %p1271_p2 = scmp.lt.s32.totalorder %s1265_s25, %s1265_s25 }
   0x8   :  { %p1272_p3 = por %p1271_p2, %p1270_p1 }
   0xa   :  { %p1273_p4 = pnand %p1272_p3, %p1266_p0 }
   0xc   :  { %1276 = shalt.err (!%p1273_p4)
}
   0xd   :  { %s1367_s26 = smov 64   ;;  %s1368_s27 = smov 4  }
   0xe   :  { %39 = dma.hbm_to_vmem [thread:$0]  %s1542_s1, 1024, %s34_s22, [#allocation6], %s1367_s26, %s1367_s26, %s1368_s27  }
   0xf   :  { %s1285_s30 = scalar_lea.vmem %s22_s24, 1088  ;;  %p1290_p6 = scmp.lt.s32.totalorder %s22_s24, %s22_s24 }
  0x10   :  { %p1286_p5 = scmp.ne.s32.totalorder %s22_s24, %s1285_s30  ;;  %p1291_p7 = scmp.lt.s32.totalorder %s1285_s30, %s1285_s30 }
  0x12   :  { %p1292_p8 = por %p1291_p7, %p1290_p6 }
  0x14   :  { %p1293_p9 = pnand %p1292_p8, %p1286_p5 }
  0x16   :  { %1296 = shalt.err (!%p1293_p9)
}
  0x17   :  { %27 = dma.hbm_to_vmem [thread:$0]  %s1541_s0, 1088, %s22_s24, [#allocation3], %s1367_s26, %s1367_s26, %s1368_s27  }
  0x18   :  { %s1369_s9 = smov [#allocation7]  }
  0x19   :  { %s47_s10 = sshll.u32 %s1369_s9, 4  ;;  %s48_s10 = int_to_ptr.vmem [resolvable:$true] %s47_s10 }
  0x1a   :  { %s1305_s11 = scalar_lea.vmem %s48_s10, 1024  ;;  %p1310_p11 = scmp.lt.s32.totalorder %s48_s10, %s48_s10 }
  0x1b   :  { %p1306_p10 = scmp.ne.s32.totalorder %s48_s10, %s1305_s11  ;;  %p1311_p12 = scmp.lt.s32.totalorder %s1305_s11, %s1305_s11 }
  0x1d   :  { %p1312_p13 = por %p1311_p12, %p1310_p11 }
  0x1f   :  { %p1313_p0 = pnand %p1312_p13, %p1306_p10 }
  0x21   :  { %1316 = shalt.err (!%p1313_p0)
}
  0x22   :  { %53 = dma.hbm_to_vmem [thread:$0]  %s1544_s3, 1024, %s48_s10, [#allocation6], %s1367_s26, %s1367_s26, %s1368_s27  }
  0x23   :  { %1357 = dma.done.wait [#allocation3], 1088  }
  0x24   :  { %1358 = vsyncadd [#allocation3], 4294966208 }
  0x25   :  { %1359 = dma.done.wait [#allocation6], 2048  }
  0x26   :  { %1360 = vsyncadd [#allocation6], 4294965248  ;;  %v1370_v0 = vmov 0.0   ;;  %vm1371_vm0 = vmmov 0   ;;  %v1232_v1 = vld [vmem:[#allocation5 + $0x38] sm:$0xff]   ;;  %v1233_v2 = vld [vmem:[#allocation5 + $0x30] sm:$0xff]  }
  0x27   :  { %1087 = vmatprep.subr.bf16.mxu0 %v1370_v0  ;;  %1103 = vmatprep.mubr.msk.bf16.mxu0 %vm1371_vm0, %v1370_v0  ;;  %v1234_v3 = vld [vmem:[#allocation5 + $0x28] sm:$0xff]   ;;  %v1235_v4 = vld [vmem:[#allocation5 + $0x20] sm:$0xff]   ;;  %v1245_v5 = vld [vmem:[#allocation7 + $0x38] sm:$0xff]  }
  0x28   :  { %1139 = vmatprep.subr.bf16.mxu1 %v1370_v0  ;;  %1155 = vmatprep.mubr.msk.bf16.mxu1 %vm1371_vm0, %v1370_v0  ;;  %v1236_v6 = vld [vmem:[#allocation5 + $0x18] sm:$0xff]   ;;  %v1247_v7 = vld [vmem:[#allocation7 + $0x30] sm:$0xff]   ;;  %v1248_v9 = vld [vmem:[#allocation7 + $0x28] sm:$0xff]  }
  0x29   :  { %1088 = vmatpush3.bf16.msra.mxu0 %v1232_v1  ;;  %1140 = vmatpush3.bf16.msra.mxu1 %v1245_v5  ;;  %v1237_v8 = vld [vmem:[#allocation5 + $0x10] sm:$0xff]   ;;  %v1238_v10 = vld [vmem:[#allocation5 + $0x8] sm:$0xff]   ;;  %v1250_v11 = vld [vmem:[#allocation7 + $0x20] sm:$0xff]  }
  0x2a   :  { %1089 = vmatprep.subr.bf16.mxu0 %v1370_v0  ;;  %1141 = vmatprep.subr.bf16.mxu1 %v1370_v0  ;;  %v1239_v12 = vld [vmem:[#allocation5] sm:$0xff]   ;;  %v1251_v13 = vld [vmem:[#allocation7 + $0x18] sm:$0xff]   ;;  %v1242_v16 = vld [vmem:[#allocation2 + $0x10] sm:$0xff]  }
  0x2b   :  { %v1240_v14 = vld [vmem:[#allocation2] sm:$0xff]   ;;  %v1241_v15 = vld [vmem:[#allocation2 + $0x8] sm:$0xff]   ;;  %v1243_v17 = vld [vmem:[#allocation2 + $0x18] sm:$0xff]  }
  0x2c   :  { %v1244_v18 = vld [vmem:[#allocation2 + $0x20] sm:$0xff]   ;;  %v1246_v19 = vld [vmem:[#allocation2 + $0x28] sm:$0xff]   ;;  %v1249_v20 = vld [vmem:[#allocation2 + $0x30] sm:$0xff]  }
  0x2d   :  { %1090 = vmatpush3.bf16.msra.mxu0 %v1233_v2  ;;  %1142 = vmatpush3.bf16.msra.mxu1 %v1247_v7  ;;  %v1252_v21 = vld [vmem:[#allocation2 + $0x38] sm:$0xff]   ;;  %v1254_v23 = vld [vmem:[#allocation7 + $0x8] sm:$0xff]   ;;  %v1256_v24 = vld [vmem:[#allocation2 + $0x40] ss:$0 sps:$4 sm:$0xff]  }
  0x2e   :  { %1091 = vmatprep.subr.bf16.mxu0 %v1370_v0  ;;  %1143 = vmatprep.subr.bf16.mxu1 %v1370_v0  ;;  %v1253_v22 = vld [vmem:[#allocation7 + $0x10] sm:$0xff]   ;;  %v1255_v25 = vld [vmem:[#allocation7] sm:$0xff]   ;;  %v1463_v26 = vld [vmem:[%s1543_s2] ss:$0 sm:$0xff] }
  0x31   :  { %1092 = vmatpush3.bf16.msra.mxu0 %v1234_v3  ;;  %1144 = vmatpush3.bf16.msra.mxu1 %v1248_v9 }
  0x32   :  { %1093 = vmatprep.subr.bf16.mxu0 %v1370_v0  ;;  %1145 = vmatprep.subr.bf16.mxu1 %v1370_v0 }
  0x35   :  { %1094 = vmatpush3.bf16.msra.mxu0 %v1235_v4  ;;  %1146 = vmatpush3.bf16.msra.mxu1 %v1250_v11 }
  0x36   :  { %1095 = vmatprep.subr.bf16.mxu0 %v1370_v0  ;;  %1147 = vmatprep.subr.bf16.mxu1 %v1370_v0 }
  0x39   :  { %1096 = vmatpush3.bf16.msra.mxu0 %v1236_v6  ;;  %1148 = vmatpush3.bf16.msra.mxu1 %v1251_v13 }
  0x3a   :  { %1097 = vmatprep.subr.bf16.mxu0 %v1370_v0  ;;  %1149 = vmatprep.subr.bf16.mxu1 %v1370_v0 }
  0x3d   :  { %1098 = vmatpush3.bf16.msra.mxu0 %v1237_v8  ;;  %1150 = vmatpush3.bf16.msra.mxu1 %v1253_v22 }
  0x3e   :  { %1099 = vmatprep.subr.bf16.mxu0 %v1370_v0  ;;  %1151 = vmatprep.subr.bf16.mxu1 %v1370_v0 }
  0x41   :  { %1100 = vmatpush3.bf16.msra.mxu0 %v1238_v10  ;;  %1152 = vmatpush3.bf16.msra.mxu1 %v1254_v23 }
  0x42   :  { %1101 = vmatprep.subr.bf16.mxu0 %v1370_v0  ;;  %1153 = vmatprep.subr.bf16.mxu1 %v1370_v0 }
  0x45   :  { %1102 = vmatpush3.bf16.msra.mxu0 %v1239_v12  ;;  %1154 = vmatpush3.bf16.msra.mxu1 %v1255_v25 }
  0x46   :  { %1191 = vmatprep.subr.mxu0 %v1370_v0  ;;  %1196 = vmatprep.subr.mxu1 %v1370_v0 }
  0x48   :  { %1104 = vmatmul.mubr.bf16.vlgmr.msra.gmra.mxu0 %v1240_v14 }
  0x49   :  { %1107 = vmatprep.mubr.msk.bf16.mxu0 %vm1371_vm0, %v1370_v0 }
  0x50   :  { %1108 = vmatmul.mubr.bf16.gmra.mxu0 %v1241_v15 }
  0x51   :  { %1111 = vmatprep.mubr.msk.bf16.mxu0 %vm1371_vm0, %v1370_v0 }
  0x58   :  { %1112 = vmatmul.mubr.bf16.gmra.mxu0 %v1242_v16 }
  0x59   :  { %1115 = vmatprep.mubr.msk.bf16.mxu0 %vm1371_vm0, %v1370_v0 }
  0x60   :  { %1116 = vmatmul.mubr.bf16.gmra.mxu0 %v1243_v17 }
  0x61   :  { %1119 = vmatprep.mubr.msk.bf16.mxu0 %vm1371_vm0, %v1370_v0 }
  0x68   :  { %1120 = vmatmul.mubr.bf16.gmra.mxu0 %v1244_v18 }
  0x69   :  { %1123 = vmatprep.mubr.msk.bf16.mxu0 %vm1371_vm0, %v1370_v0 }
  0x70   :  { %1124 = vmatmul.mubr.bf16.gmra.mxu0 %v1246_v19 }
  0x71   :  { %1127 = vmatprep.mubr.msk.bf16.mxu0 %vm1371_vm0, %v1370_v0 }
  0x78   :  { %1128 = vmatmul.mubr.bf16.gmra.mxu0 %v1249_v20 }
  0x79   :  { %1131 = vmatprep.mubr.msk.bf16.mxu0 %vm1371_vm0, %v1370_v0 }
  0x80   :  { %1132 = vmatmul.mubr.bf16.gmra.mxu0 %v1252_v21 }
  0x81   :  { %1135 = vmatprep.mubr.msk.bf16.mxu0 %vm1371_vm0, %v1370_v0 }
  0x88   :  { %1136 = vmatmul.mubr.bf16.gmra.mxu0 %v1256_v24 }
  0x89   :  { %1193 = vmatprep.mubr.msk.f32.mxu0 %vm1371_vm0, %v1370_v0 }
 0x108   :  { %v240_v27 = vpop.f32.mrf.mxu0 }
 0x109   :  { %v241_v29 = vadd.f32 %v1463_v26, %v240_v27 }
 0x10a   :  { %v1105_v28 = vpop.f32.mrf.mxu0 }
 0x10b   :  { %v310_v33 = vmax.f32 %v241_v29, 0.0 }
 0x10c   :  { %v243_v30 = vpop.f32.mrf.mxu0 }
 0x10d   :  { %v244_v31 = vadd.f32 %v1463_v26, %v243_v30 }
 0x10e   :  { %v1106_v32 = vpop.f32.mrf.mxu0 }
 0x10f   :  { %v311_v34 = vmax.f32 %v244_v31, 0.0 }
 0x110   :  { %v248_v35 = vpop.f32.mrf.mxu0 }
 0x111   :  { %v327_v36 = vpack.c.bf16 %v311_v34, %v310_v33  ;;  %v249_v37 = vadd.f32 %v1463_v26, %v248_v35 }
 0x112   :  { %v1109_v38 = vpop.f32.mrf.mxu0 }
 0x113   :  { %1156 = vmatmul.mubr.bf16.vlgmr.msra.gmra.mxu1 %v327_v36  ;;  %v312_v40 = vmax.f32 %v249_v37, 0.0 }
 0x114   :  { %v251_v39 = vpop.f32.mrf.mxu0  ;;  %1159 = vmatprep.mubr.msk.bf16.mxu1 %vm1371_vm0, %v1370_v0 }
 0x115   :  { %v252_v41 = vadd.f32 %v1463_v26, %v251_v39 }
 0x116   :  { %v1110_v42 = vpop.f32.mrf.mxu0 }
 0x117   :  { %v313_v43 = vmax.f32 %v252_v41, 0.0 }
 0x118   :  { %v256_v44 = vpop.f32.mrf.mxu0 }
 0x119   :  { %v328_v45 = vpack.c.bf16 %v313_v43, %v312_v40  ;;  %v257_v46 = vadd.f32 %v1463_v26, %v256_v44  ;;  %v1503_v44 = vld [vmem:[%s1545_s4] ss:$0 sm:$0xff]  ;;  %s1372_s4 = smov [#allocation9]  }
 0x11a   :  { %v1113_v47 = vpop.f32.mrf.mxu0  ;;  %s997_s14 = sshll.u32 %s1372_s4, 4  ;;  %s998_s14 = int_to_ptr.vmem [resolvable:$true] %s997_s14 }
 0x11b   :  { %1160 = vmatmul.mubr.bf16.gmra.mxu1 %v328_v45  ;;  %v314_v49 = vmax.f32 %v257_v46, 0.0  ;;  %s1317_s15 = scalar_lea.vmem %s998_s14, 2176  ;;  %p1322_p2 = scmp.lt.s32.totalorder %s998_s14, %s998_s14 }
 0x11c   :  { %v259_v48 = vpop.f32.mrf.mxu0  ;;  %1163 = vmatprep.mubr.msk.bf16.mxu1 %vm1371_vm0, %v1370_v0  ;;  %p1318_p1 = scmp.ne.s32.totalorder %s998_s14, %s1317_s15  ;;  %p1323_p3 = scmp.lt.s32.totalorder %s1317_s15, %s1317_s15 }
 0x11d   :  { %v260_v50 = vadd.f32 %v1463_v26, %v259_v48 }
 0x11e   :  { %v1114_v51 = vpop.f32.mrf.mxu0  ;;  %p1324_p4 = por %p1323_p3, %p1322_p2 }
 0x11f   :  { %v315_v52 = vmax.f32 %v260_v50, 0.0 }
 0x120   :  { %v264_v53 = vpop.f32.mrf.mxu0  ;;  %p1325_p5 = pnand %p1324_p4, %p1318_p1 }
 0x121   :  { %v329_v54 = vpack.c.bf16 %v315_v52, %v314_v49  ;;  %v265_v55 = vadd.f32 %v1463_v26, %v264_v53 }
 0x122   :  { %v1117_v56 = vpop.f32.mrf.mxu0 }
 0x123   :  { %1164 = vmatmul.mubr.bf16.gmra.mxu1 %v329_v54  ;;  %v316_v58 = vmax.f32 %v265_v55, 0.0 }
 0x124   :  { %v267_v57 = vpop.f32.mrf.mxu0  ;;  %1167 = vmatprep.mubr.msk.bf16.mxu1 %vm1371_vm0, %v1370_v0 }
 0x125   :  { %v268_v59 = vadd.f32 %v1463_v26, %v267_v57 }
 0x126   :  { %v1118_v60 = vpop.f32.mrf.mxu0 }
 0x127   :  { %v317_v61 = vmax.f32 %v268_v59, 0.0 }
 0x128   :  { %v272_v62 = vpop.f32.mrf.mxu0 }
 0x129   :  { %v330_v63 = vpack.c.bf16 %v317_v61, %v316_v58  ;;  %v273_v1 = vadd.f32 %v1463_v26, %v272_v62 }
 0x12a   :  { %v1121_v2 = vpop.f32.mrf.mxu0 }
 0x12b   :  { %1168 = vmatmul.mubr.bf16.gmra.mxu1 %v330_v63  ;;  %v318_v4 = vmax.f32 %v273_v1, 0.0 }
 0x12c   :  { %v275_v3 = vpop.f32.mrf.mxu0  ;;  %1171 = vmatprep.mubr.msk.bf16.mxu1 %vm1371_vm0, %v1370_v0 }
 0x12d   :  { %v276_v5 = vadd.f32 %v1463_v26, %v275_v3 }
 0x12e   :  { %v1122_v6 = vpop.f32.mrf.mxu0 }
 0x12f   :  { %v319_v7 = vmax.f32 %v276_v5, 0.0 }
 0x130   :  { %v280_v8 = vpop.f32.mrf.mxu0 }
 0x131   :  { %v331_v9 = vpack.c.bf16 %v319_v7, %v318_v4  ;;  %v281_v10 = vadd.f32 %v1463_v26, %v280_v8 }
 0x132   :  { %v1125_v11 = vpop.f32.mrf.mxu0 }
 0x133   :  { %1172 = vmatmul.mubr.bf16.gmra.mxu1 %v331_v9  ;;  %v320_v13 = vmax.f32 %v281_v10, 0.0 }
 0x134   :  { %v283_v12 = vpop.f32.mrf.mxu0  ;;  %1175 = vmatprep.mubr.msk.bf16.mxu1 %vm1371_vm0, %v1370_v0 }
 0x135   :  { %v284_v14 = vadd.f32 %v1463_v26, %v283_v12 }
 0x136   :  { %v1126_v15 = vpop.f32.mrf.mxu0 }
 0x137   :  { %v321_v16 = vmax.f32 %v284_v14, 0.0 }
 0x138   :  { %v288_v17 = vpop.f32.mrf.mxu0 }
 0x139   :  { %v332_v18 = vpack.c.bf16 %v321_v16, %v320_v13  ;;  %v289_v19 = vadd.f32 %v1463_v26, %v288_v17 }
 0x13a   :  { %v1129_v20 = vpop.f32.mrf.mxu0 }
 0x13b   :  { %1176 = vmatmul.mubr.bf16.gmra.mxu1 %v332_v18  ;;  %v322_v22 = vmax.f32 %v289_v19, 0.0 }
 0x13c   :  { %v291_v21 = vpop.f32.mrf.mxu0  ;;  %1179 = vmatprep.mubr.msk.bf16.mxu1 %vm1371_vm0, %v1370_v0 }
 0x13d   :  { %v292_v23 = vadd.f32 %v1463_v26, %v291_v21 }
 0x13e   :  { %v1130_v24 = vpop.f32.mrf.mxu0 }
 0x13f   :  { %v323_v25 = vmax.f32 %v292_v23, 0.0 }
 0x140   :  { %v296_v27 = vpop.f32.mrf.mxu0 }
 0x141   :  { %v333_v28 = vpack.c.bf16 %v323_v25, %v322_v22  ;;  %v297_v29 = vadd.f32 %v1463_v26, %v296_v27 }
 0x142   :  { %v1133_v30 = vpop.f32.mrf.mxu0 }
 0x143   :  { %1180 = vmatmul.mubr.bf16.gmra.mxu1 %v333_v28  ;;  %v324_v32 = vmax.f32 %v297_v29, 0.0 }
 0x144   :  { %v299_v31 = vpop.f32.mrf.mxu0  ;;  %1183 = vmatprep.mubr.msk.bf16.mxu1 %vm1371_vm0, %v1370_v0 }
 0x145   :  { %v300_v33 = vadd.f32 %v1463_v26, %v299_v31 }
 0x146   :  { %v1134_v34 = vpop.f32.mrf.mxu0 }
 0x147   :  { %v325_v35 = vmax.f32 %v300_v33, 0.0 }
 0x148   :  { %v304_v37 = vpop.f32.mrf.mxu0 }
 0x149   :  { %v334_v36 = vpack.c.bf16 %v325_v35, %v324_v32  ;;  %v305_v38 = vadd.f32 %v1463_v26, %v304_v37 }
 0x14a   :  { %v1137_v39 = vpop.f32.mrf.mxu0 }
 0x14b   :  { %1184 = vmatmul.mubr.bf16.gmra.mxu1 %v334_v36  ;;  %v326_v40 = vmax.f32 %v305_v38, 0.0 }
 0x14c   :  { %1187 = vmatprep.mubr.msk.bf16.mxu1 %vm1371_vm0, %v1370_v0  ;;  %v307_v41 = vpop.f32.mrf.mxu0 }
 0x14d   :  { %v335_v42 = vpack.c.bf16 %v326_v40, %v326_v40 }
 0x14e   :  { %v1138_v43 = vpop.f32.mrf.mxu0 }
 0x153   :  { %1188 = vmatmul.mubr.bf16.gmra.mxu1 %v335_v42 }
 0x154   :  { %1198 = vmatprep.mubr.msk.f32.mxu1 %vm1371_vm0, %v1370_v0 }
 0x1d3   :  { %v441_v45 = vpop.f32.mrf.mxu1 }
 0x1d4   :  { %v442_v46 = vadd.f32 %v1503_v44, %v441_v45 }
 0x1d5   :  { %v1157_v47 = vpop.f32.mrf.mxu1 }
 0x1d6   :  { %511 = vst [vmem:[#allocation9] sm:$0xff] %v442_v46  ;;  %v565_v26 = vand.u32 4294901760, %v442_v46 }
 0x1d7   :  { %v444_v48 = vpop.f32.mrf.mxu1 }
 0x1d8   :  { %v601_v49 = vsub.f32 %v442_v46, %v565_v26  ;;  %v445_v50 = vadd.f32 %v1503_v44, %v444_v48  ;;  %1192 = vmatpush3.xpose.msra.mxu0 %v565_v26 }
 0x1d9   :  { %v1158_v51 = vpop.f32.mrf.mxu1  ;;  %1201 = vmatprep.subr.mxu0 %v1370_v0 }
 0x1da   :  { %v602_v52 = vand.u32 4294901760, %v601_v49  ;;  %512 = vst [vmem:[#allocation9 + $0x8] sm:$0xff] %v445_v50 }
 0x1db   :  { %v449_v53 = vpop.f32.mrf.mxu1 }
 0x1dc   :  { %v603_v54 = vsub.f32 %v601_v49, %v602_v52  ;;  %v450_v55 = vadd.f32 %v1503_v44, %v449_v53 }
 0x1dd   :  { %v1161_v56 = vpop.f32.mrf.mxu1 }
 0x1de   :  { %v604_v57 = vand.u32 4294901760, %v603_v54  ;;  %513 = vst [vmem:[#allocation9 + $0x10] sm:$0xff] %v450_v55 }
 0x1df   :  { %v452_v58 = vpop.f32.mrf.mxu1 }
 0x1e0   :  { %1194 = vmatmul.mubr.f32.vlgmr.msra.gmra.mxu0 %v604_v57  ;;  %1197 = vmatpush3.xpose.msra.mxu1 %v604_v57  ;;  %v453_v59 = vadd.f32 %v1503_v44, %v452_v58 }
 0x1e1   :  { %1202 = vmatpush3.xpose.msra.mxu0 %v601_v49  ;;  %1203 = vmatprep.mubr.msk.f32.mxu0 %vm1371_vm0, %v1370_v0  ;;  %v1162_v60 = vpop.f32.mrf.mxu1 }
 0x1e2   :  { %1206 = vmatprep.subr.mxu1 %v1370_v0  ;;  %1211 = vmatprep.subr.mxu0 %v1370_v0  ;;  %514 = vst [vmem:[#allocation9 + $0x18] sm:$0xff] %v453_v59 }
 0x1e3   :  { %1199 = vmatmul.mubr.f32.vlgmr.msra.gmra.mxu1 %v565_v26  ;;  %v457_v61 = vpop.f32.mrf.mxu1 }
 0x1e4   :  { %1204 = vmatmul.mubr.f32.vlgmr.msra.gmra.mxu0 %v601_v49  ;;  %1207 = vmatpush3.xpose.msra.mxu1 %v565_v26  ;;  %v458_v62 = vadd.f32 %v1503_v44, %v457_v61 }
 0x1e5   :  { %1212 = vmatpush3.xpose.msra.mxu0 %v602_v52  ;;  %1208 = vmatprep.mubr.msk.f32.mxu1 %vm1371_vm0, %v1370_v0  ;;  %v1165_v63 = vpop.f32.mrf.mxu1 }
 0x1e6   :  { %1213 = vmatprep.mubr.msk.f32.mxu0 %vm1371_vm0, %v1370_v0  ;;  %1216 = vmatprep.subr.mxu1 %v1370_v0  ;;  %515 = vst [vmem:[#allocation9 + $0x20] sm:$0xff] %v458_v62 }
 0x1e7   :  { %1209 = vmatmul.mubr.f32.vlgmr.msra.gmra.mxu1 %v602_v52  ;;  %v460_v1 = vpop.f32.mrf.mxu1 }
 0x1e8   :  { %1214 = vmatmul.mubr.f32.vlgmr.msra.gmra.mxu0 %v565_v26  ;;  %1217 = vmatpush3.xpose.msra.mxu1 %v565_v26  ;;  %v461_v2 = vadd.f32 %v1503_v44, %v460_v1 }
 0x1e9   :  { %1218 = vmatprep.mubr.msk.f32.mxu1 %vm1371_vm0, %v1370_v0  ;;  %v1166_v3 = vpop.f32.mrf.mxu1 }
 0x1ea   :  { %516 = vst [vmem:[#allocation9 + $0x28] sm:$0xff] %v461_v2 }
 0x1eb   :  { %1219 = vmatmul.mubr.f32.vlgmr.msra.gmra.mxu1 %v565_v26  ;;  %v465_v4 = vpop.f32.mrf.mxu1 }
 0x1ec   :  { %v466_v5 = vadd.f32 %v1503_v44, %v465_v4 }
 0x1ed   :  { %v1169_v6 = vpop.f32.mrf.mxu1 }
 0x1ee   :  { %517 = vst [vmem:[#allocation9 + $0x30] sm:$0xff] %v466_v5 }
 0x1ef   :  { %v468_v7 = vpop.f32.mrf.mxu1 }
 0x1f0   :  { %v469_v8 = vadd.f32 %v1503_v44, %v468_v7 }
 0x1f1   :  { %v1170_v9 = vpop.f32.mrf.mxu1 }
 0x1f2   :  { %518 = vst [vmem:[#allocation9 + $0x38] sm:$0xff] %v469_v8 }
 0x1f3   :  { %v473_v10 = vpop.f32.mrf.mxu1 }
 0x1f4   :  { %v474_v11 = vadd.f32 %v1503_v44, %v473_v10 }
 0x1f5   :  { %v1173_v12 = vpop.f32.mrf.mxu1 }
 0x1f6   :  { %519 = vst [vmem:[#allocation9 + $0x40] sm:$0xff] %v474_v11 }
 0x1f7   :  { %v476_v13 = vpop.f32.mrf.mxu1 }
 0x1f8   :  { %v477_v14 = vadd.f32 %v1503_v44, %v476_v13 }
 0x1f9   :  { %v1174_v15 = vpop.f32.mrf.mxu1 }
 0x1fa   :  { %520 = vst [vmem:[#allocation9 + $0x48] sm:$0xff] %v477_v14 }
 0x1fb   :  { %v481_v16 = vpop.f32.mrf.mxu1 }
 0x1fc   :  { %v482_v17 = vadd.f32 %v1503_v44, %v481_v16 }
 0x1fd   :  { %v1177_v18 = vpop.f32.mrf.mxu1 }
 0x1fe   :  { %521 = vst [vmem:[#allocation9 + $0x50] sm:$0xff] %v482_v17 }
 0x1ff   :  { %v484_v19 = vpop.f32.mrf.mxu1 }
 0x200   :  { %v485_v20 = vadd.f32 %v1503_v44, %v484_v19 }
 0x201   :  { %v1178_v21 = vpop.f32.mrf.mxu1 }
 0x202   :  { %522 = vst [vmem:[#allocation9 + $0x58] sm:$0xff] %v485_v20 }
 0x203   :  { %v489_v22 = vpop.f32.mrf.mxu1 }
 0x204   :  { %v490_v23 = vadd.f32 %v1503_v44, %v489_v22 }
 0x205   :  { %v1181_v24 = vpop.f32.mrf.mxu1 }
 0x206   :  { %523 = vst [vmem:[#allocation9 + $0x60] sm:$0xff] %v490_v23 }
 0x207   :  { %v492_v25 = vpop.f32.mrf.mxu1 }
 0x208   :  { %v493_v27 = vadd.f32 %v1503_v44, %v492_v25 }
 0x209   :  { %v1182_v28 = vpop.f32.mrf.mxu1 }
 0x20a   :  { %524 = vst [vmem:[#allocation9 + $0x68] sm:$0xff] %v493_v27 }
 0x20b   :  { %v497_v29 = vpop.f32.mrf.mxu1 }
 0x20c   :  { %v498_v30 = vadd.f32 %v1503_v44, %v497_v29 }
 0x20d   :  { %v1185_v31 = vpop.f32.mrf.mxu1 }
 0x20e   :  { %525 = vst [vmem:[#allocation9 + $0x70] sm:$0xff] %v498_v30 }
 0x20f   :  { %v500_v32 = vpop.f32.mrf.mxu1 }
 0x210   :  { %v501_v33 = vadd.f32 %v1503_v44, %v500_v32 }
 0x211   :  { %v1186_v34 = vpop.f32.mrf.mxu1 }
 0x212   :  { %526 = vst [vmem:[#allocation9 + $0x78] sm:$0xff] %v501_v33 }
 0x213   :  { %v505_v35 = vpop.f32.mrf.mxu1 }
 0x214   :  { %v506_v36 = vadd.f32 %v1503_v44, %v505_v35 }
 0x215   :  { %v1189_v37 = vpop.f32.mrf.mxu1 }
 0x216   :  { %527 = vst [vmem:[#allocation9 + $0x80] sm:$0xff] %v506_v36 }
 0x217   :  { %v508_v38 = vpop.f32.mrf.mxu1 }
 0x219   :  { %v1190_v39 = vpop.f32.mrf.mxu1 }
 0x21a   :  { %1328 = shalt.err (!%p1325_p5)
}
 0x21b   :  { %s1373_s16 = smov 128   ;;  %s1374_s17 = smov 8   ;;  %v528_v40 = vlaneseq  ;;  %vm980_vm2 = vcmask 64512  }
 0x21c   :  { %1003 = dma.vmem_to_hbm [thread:$0]  %s998_s14, 2176, %s1547_s6, [#allocation10], %s1373_s16, %s1373_s16, %s1374_s17  }
 0x21d   :  { %v529_v41 = vshrl.u32 %v528_v40, 7  ;;  %v531_v42 = vand.u32 127, %v528_v40  ;;  %s1375_s6 = smov [#allocation8]  }
 0x21e   :  { %s988_s20 = sshll.u32 %s1375_s6, 4  ;;  %s989_s20 = int_to_ptr.vmem [resolvable:$true] %s988_s20 }
 0x21f   :  { %vm532_vm1 = vcmp.eq.s32.totalorder %v529_v41, %v531_v42  ;;  %s1337_s21 = scalar_lea.vmem %s989_s20, 128  ;;  %p1342_p7 = scmp.lt.s32.totalorder %s989_s20, %s989_s20 }
 0x220   :  { %v533_v43 = vsel %vm532_vm1, 0.8, %v1370_v0  ;;  %p1338_p6 = scmp.ne.s32.totalorder %s989_s20, %s1337_s21  ;;  %p1343_p8 = scmp.lt.s32.totalorder %s1337_s21, %s1337_s21 }
 0x222   :  { %p1344_p9 = por %p1343_p8, %p1342_p7 }
 0x224   :  { %p1345_p10 = pnand %p1344_p9, %p1338_p6 }
 0x2a0   :  { %v606_v44 = vpop.f32.mrf.mxu0 }
 0x2a1   :  { %v607_v45 = vadd.f32 %v606_v44, %v533_v43 }
 0x2a2   :  { %v1195_v46 = vpop.f32.mrf.mxu0 }
 0x2a3   :  { %v682_v47 = vpop.f32.mrf.mxu1 }
 0x2a4   :  { %v683_v26 = vadd.f32 %v682_v47, %v607_v45  ;;  %v756_v48 = vpop.f32.mrf.mxu0 }
 0x2a5   :  { %v1200_v49 = vpop.f32.mrf.mxu1 }
 0x2a6   :  { %v757_v50 = vadd.f32 %v756_v48, %v683_v26  ;;  %v1205_v51 = vpop.f32.mrf.mxu0 }
 0x2a7   :  { %v830_v52 = vpop.f32.mrf.mxu1 }
 0x2a8   :  { %v831_v53 = vadd.f32 %v830_v52, %v757_v50  ;;  %v904_v54 = vpop.f32.mrf.mxu0 }
 0x2a9   :  { %v1210_v55 = vpop.f32.mrf.mxu1 }
 0x2aa   :  { %v905_v56 = vadd.f32 %v904_v54, %v831_v53  ;;  %v1215_v57 = vpop.f32.mrf.mxu0 }
 0x2ab   :  { %v976_v58 = vpop.f32.mrf.mxu1 }
 0x2ac   :  { %v977_v0 = vadd.f32 %v976_v58, %v905_v56 }
 0x2ad   :  { %v1220_v59 = vpop.f32.mrf.mxu1 }
 0x2ae   :  { %981 = vst.msk [vmem:[#allocation8] sm:$0xff] %vm980_vm2, %v977_v0 }
 0x2af   :  { %1348 = shalt.err (!%p1345_p10)
}
 0x2b0   :  { %991 = dma.vmem_to_hbm [thread:$0]  %s989_s20, 128, %s1546_s5, [#allocation4]  }
 0x2b1   :  { %1361 = dma.done.wait [#allocation4], 128  }
 0x2b2   :  { %1362 = vsyncadd [#allocation4], 4294967168 }
 0x2b3   :  { %1363 = dma.done.wait [#allocation10], 2176  }
 0x2b4   :  { %1364 = vsyncadd [#allocation10], 4294965120 }
 0x2b5   :  { %1010 = vsyncpa [#allocation3], 1 }
 0x2b6   :  { %1011 = vsyncpa [#allocation6], 1 }
 0x2b7   :  { %1012 = vsyncpa [#allocation4], 1 }
 0x2b8   :  { %1013 = vsyncpa [#allocation10], 1 }

</bundles_post_ra>
